<compile_context>
chip_gen: v5e
topology: v5e:2x2
jax: 0.10.0
libtpu: 0.0.40
codegen_flags: <defaults>
</compile_context>

<pallas_src>
import functools

import jax
import jax.numpy as jnp
from jax.experimental import pallas as pl
from jax.experimental.pallas import tpu as pltpu


K_PAD = 128      # im2col contraction dim (9*C) padded to full lane width
COUT_PAD = 128   # conv output channels padded to full lane width
NCLS_PAD = 128   # classifier logits padded to full lane width


def prepare_params(wc, bc, wf, bf, H, W):
    """One-time preprocessing of the synthetic net's weights (hoisted out of
    the per-call path).  Returns lane-padded, MXU-ready operands."""
    cout, C, _, _ = wc.shape
    ncls = wf.shape[0]

    # w_mat[(kh*3+kw)*C + c, cout] = wc[cout, c, kh, kw], lane/sublane padded.
    w_taps = jnp.transpose(wc.astype(jnp.float32), (2, 3, 1, 0)).reshape(9 * C, cout)
    w_mat = (jnp.zeros((K_PAD, COUT_PAD), jnp.float32)
             .at[:9 * C, :cout].set(w_taps).astype(jnp.bfloat16))

    bc_row = (jnp.zeros((1, COUT_PAD), jnp.float32)
              .at[0, :cout].set(bc.astype(jnp.float32)))

    # Global-average-pool as a matmul: row 0 of an (8, H*W) selector is
    # 1/(H*W); rows 1..7 are zero padding to a full sublane tile.
    pool_mat = (jnp.zeros((8, H * W), jnp.float32)
                .at[0].set(1.0 / float(H * W)).astype(jnp.bfloat16))

    wf_mat = (jnp.zeros((COUT_PAD, NCLS_PAD), jnp.float32)
              .at[:cout, :ncls].set(wf.astype(jnp.float32).T).astype(jnp.bfloat16))
    bf_row = (jnp.zeros((1, NCLS_PAD), jnp.float32)
              .at[0, :ncls].set(bf.astype(jnp.float32)))

    return w_mat, bc_row, pool_mat, wf_mat, bf_row


def _kernel(x_ref, w_ref, bc_ref, pool_ref, wf_ref, bf_ref, o_ref):
    # x_ref:    (H*W, K_PAD)        bf16 im2col of sample 0 (36 real columns)
    # w_ref:    (K_PAD, COUT_PAD)   bf16 conv weights
    # bc_ref:   (1, COUT_PAD)       f32 conv bias
    # pool_ref: (8, H*W)            bf16 avg-pool selector (row 0 real)
    # wf_ref:   (COUT_PAD, NCLS_PAD) bf16 FC weights
    # bf_ref:   (1, NCLS_PAD)       f32 FC bias
    # o_ref:    (8, NCLS_PAD)       f32, row 0 holds the logits
    h = jnp.dot(x_ref[...], w_ref[...],
                preferred_element_type=jnp.float32)            # (H*W, 128) f32
    h = jnp.maximum(h + bc_ref[...], 0.0)                      # lane-dense ReLU (f32)
    pooled = jnp.dot(pool_ref[...], h.astype(jnp.bfloat16),
                     preferred_element_type=jnp.float32)       # (8, 128) f32
    logits = jnp.dot(pooled.astype(jnp.bfloat16), wf_ref[...],
                     preferred_element_type=jnp.float32) + bf_ref[...]
    o_ref[...] = logits                                        # unmasked 128-lane store


@functools.partial(jax.jit, static_argnames=("ncls",))
def mod_forward(x_nchw, w_mat, bc_row, pool_mat, wf_mat, bf_row, *, ncls):
    """Replicates Mod.forward: returns net(x)[0] (logits of batch sample 0)."""
    _, C, H, W = x_nchw.shape

    # ---- per-call work: im2col of sample 0 only (Mod.forward drops the rest) ----
    x0 = jnp.transpose(x_nchw[0], (1, 2, 0)).astype(jnp.float32)     # (H, W, C)
    xp = jnp.pad(x0, ((1, 1), (1, 1), (0, 0)))                       # (H+2, W+2, C)
    cols = [xp[kh:kh + H, kw:kw + W, :].reshape(H * W, C)
            for kh in range(3) for kw in range(3)]
    x_cols = jnp.concatenate(cols, axis=1)                           # (H*W, 9*C)
    x_cols = jnp.pad(x_cols, ((0, 0), (0, K_PAD - 9 * C))).astype(jnp.bfloat16)

    vmem = pl.BlockSpec(memory_space=pltpu.MemorySpace.VMEM)
    out = pl.pallas_call(
        _kernel,
        out_shape=jax.ShapeDtypeStruct((8, NCLS_PAD), jnp.float32),
        in_specs=[vmem] * 6,
        out_specs=vmem,
    )(x_cols, w_mat, bc_row, pool_mat, wf_mat, bf_row)

    # Mod.forward: `return self.net(x)[0]` -> logits of sample 0.
    return out[0, :ncls]


def _reference(x, wc, bc, wf, bf):
    """Pure-JAX reference of the synthetic net, for a correctness check."""
    y = jax.lax.conv_general_dilated(
        x, wc, window_strides=(1, 1), padding="SAME",
        dimension_numbers=("NCHW", "OIHW", "NCHW"),
        precision=jax.lax.Precision.HIGHEST)
    y = jnp.maximum(y + bc[None, :, None, None], 0.0)
    pooled = jnp.mean(y, axis=(2, 3))
    logits = jnp.dot(pooled, wf.T, precision=jax.lax.Precision.HIGHEST) + bf
    return logits[0]


if __name__ == "__main__":
    key = jax.random.PRNGKey(0)
    k_x, k_wc, k_bc, k_wf, k_bf = jax.random.split(key, 5)

    B, C, H, W = 2, 4, 16, 16
    COUT, NCLS = 8, 10

    x = jax.random.normal(k_x, (B, C, H, W), dtype=jnp.float32)
    # Deterministic synthetic parameters (PyTorch Conv2d / Linear shapes).
    wc = 0.1 * jax.random.normal(k_wc, (COUT, C, 3, 3), dtype=jnp.float32)
    bc = 0.1 * jax.random.normal(k_bc, (COUT,), dtype=jnp.float32)
    wf = 0.1 * jax.random.normal(k_wf, (NCLS, COUT), dtype=jnp.float32)
    bf = 0.1 * jax.random.normal(k_bf, (NCLS,), dtype=jnp.float32)

    # Weight preprocessing happens once (outside the per-iteration path).
    params = prepare_params(wc, bc, wf, bf, H, W)
    params = jax.tree_util.tree_map(jax.block_until_ready, params)

    out = mod_forward(x, *params, ncls=NCLS)
    jax.block_until_ready(out)
    assert out.shape == (NCLS,)

    ref = _reference(x, wc, bc, wf, bf)
    assert jnp.allclose(out, ref, atol=1e-2, rtol=1e-2), (out, ref)
    print("KERNEL_OK")
</pallas_src>

<mosaic_0001>
module attributes {stable_mosaic.version = 11 : i64} {
  func.func @_kernel(%arg0: memref<256x128xbf16, #tpu.memory_space<vmem>>, %arg1: memref<128x128xbf16, #tpu.memory_space<vmem>>, %arg2: memref<1x128xf32, #tpu.memory_space<vmem>>, %arg3: memref<8x256xbf16, #tpu.memory_space<vmem>>, %arg4: memref<128x128xbf16, #tpu.memory_space<vmem>>, %arg5: memref<1x128xf32, #tpu.memory_space<vmem>>, %arg6: memref<8x128xf32, #tpu.memory_space<vmem>>) attributes {dimension_semantics = [], scalar_prefetch = 0 : i64, scratch_operands = 0 : i64, tpu.core_type = #tpu.core_type<tc>} {
    %c0 = arith.constant 0 : index
    %c0_0 = arith.constant 0 : index
    %0 = vector.load %arg0[%c0, %c0_0] : memref<256x128xbf16, #tpu.memory_space<vmem>>, vector<256x128xbf16>
    %c0_1 = arith.constant 0 : index
    %c0_2 = arith.constant 0 : index
    %1 = vector.load %arg1[%c0_1, %c0_2] : memref<128x128xbf16, #tpu.memory_space<vmem>>, vector<128x128xbf16>
    %cst = arith.constant dense<0.000000e+00> : vector<256x128xf32>
    %2 = tpu.matmul %0, %1, %cst {dimension_numbers = #tpu.dot_dimension_numbers<[1], [0], [0], [1], [0, 0, 1, 1], [], []>} : vector<256x128xbf16>, vector<128x128xbf16>, vector<256x128xf32> -> vector<256x128xf32>
    %c0_3 = arith.constant 0 : index
    %c0_4 = arith.constant 0 : index
    %3 = vector.load %arg2[%c0_3, %c0_4] : memref<1x128xf32, #tpu.memory_space<vmem>>, vector<1x128xf32>
    %4 = vector.broadcast %3 : vector<1x128xf32> to vector<256x128xf32>
    %5 = arith.addf %2, %4 : vector<256x128xf32>
    %cst_5 = arith.constant 0.000000e+00 : f32
    %6 = vector.broadcast %cst_5 : f32 to vector<256x128xf32>
    %7 = arith.maximumf %5, %6 : vector<256x128xf32>
    %c0_6 = arith.constant 0 : index
    %c0_7 = arith.constant 0 : index
    %8 = vector.load %arg3[%c0_6, %c0_7] : memref<8x256xbf16, #tpu.memory_space<vmem>>, vector<8x256xbf16>
    %9 = arith.truncf %7 : vector<256x128xf32> to vector<256x128xbf16>
    %cst_8 = arith.constant dense<0.000000e+00> : vector<8x128xf32>
    %10 = tpu.matmul %8, %9, %cst_8 {dimension_numbers = #tpu.dot_dimension_numbers<[1], [0], [0], [1], [0, 0, 1, 1], [], []>} : vector<8x256xbf16>, vector<256x128xbf16>, vector<8x128xf32> -> vector<8x128xf32>
    %11 = arith.truncf %10 : vector<8x128xf32> to vector<8x128xbf16>
    %c0_9 = arith.constant 0 : index
    %c0_10 = arith.constant 0 : index
    %12 = vector.load %arg4[%c0_9, %c0_10] : memref<128x128xbf16, #tpu.memory_space<vmem>>, vector<128x128xbf16>
    %cst_11 = arith.constant dense<0.000000e+00> : vector<8x128xf32>
    %13 = tpu.matmul %11, %12, %cst_11 {dimension_numbers = #tpu.dot_dimension_numbers<[1], [0], [0], [1], [0, 0, 1, 1], [], []>} : vector<8x128xbf16>, vector<128x128xbf16>, vector<8x128xf32> -> vector<8x128xf32>
    %c0_12 = arith.constant 0 : index
    %c0_13 = arith.constant 0 : index
    %14 = vector.load %arg5[%c0_12, %c0_13] : memref<1x128xf32, #tpu.memory_space<vmem>>, vector<1x128xf32>
    %15 = vector.broadcast %14 : vector<1x128xf32> to vector<8x128xf32>
    %16 = arith.addf %13, %15 : vector<8x128xf32>
    %c0_14 = arith.constant 0 : index
    %c0_15 = arith.constant 0 : index
    %17 = vector.load %arg6[%c0_14, %c0_15] : memref<8x128xf32, #tpu.memory_space<vmem>>, vector<8x128xf32>
    tpu.vector_store %arg6[%c0_14, %c0_15], %16 {strides = array<i32>} : memref<8x128xf32, #tpu.memory_space<vmem>>, vector<8x128xf32>,
    return
  }
}

</mosaic_0001>

<bundles_post_ra>
// kernel: mod_forward.1
= control target key start
LH: loop header
LB: loop body
LE: loop exit
PB: predicated region body
PF: predicated region fallthrough
CT: control target
= control target key end

     0   :  { %s858_s1 = inlined_call_operand.vmem [shape: bf16[128,128], index: 1, kind: input, shape index: {}]   ;;  %s859_s2 = inlined_call_operand.vmem [shape: f32[1,128], index: 2, kind: input, shape index: {}]   ;;  %s860_s0 = inlined_call_operand.vmem [shape: bf16[256,128], index: 0, kind: input, shape index: {}]   ;;  %s861_s4 = inlined_call_operand.vmem [shape: bf16[128,128], index: 4, kind: input, shape index: {}]   ;;  %s862_s3 = inlined_call_operand.vmem [shape: bf16[8,256], index: 3, kind: input, shape index: {}]   ;;  %s863_s5 = inlined_call_operand.vmem [shape: f32[1,128], index: 5, kind: input, shape index: {}]   ;;  %s864_s6 = inlined_call_operand.vmem [shape: f32[8,128], index: 6, kind: output, shape index: {}]  }
   0x1   :  { %v628_v0 = vld [vmem:[%s858_s1 + $0x38] sm:$0xff]  ;;  %v627_v1 = vld [vmem:[%s858_s1 + $0x30] sm:$0xff]  ;;  %v626_v2 = vld [vmem:[%s858_s1 + $0x28] sm:$0xff] }
   0x2   :  { %219 = vmatpush.bf16.msra.mxu0 %v628_v0  ;;  %637 = vmatpush.bf16.msra.mxu1 %v628_v0  ;;  %v625_v3 = vld [vmem:[%s858_s1 + $0x20] sm:$0xff]  ;;  %v624_v4 = vld [vmem:[%s858_s1 + $0x18] sm:$0xff]  ;;  %v623_v5 = vld [vmem:[%s858_s1 + $0x10] sm:$0xff] }
   0x3   :  { %638 = vmatpush.bf16.msra.mxu2 %v628_v0  ;;  %639 = vmatpush.bf16.msra.mxu3 %v628_v0  ;;  %v622_v6 = vld [vmem:[%s858_s1 + $0x8] sm:$0xff]  ;;  %v621_v7 = vld [vmem:[%s858_s1] sm:$0xff]  ;;  %v611_v13 = vld [vmem:[%s860_s0 + $0x30] sm:$0xff] }
   0x4   :  { %v605_v8 = vld [vmem:[%s860_s0] sm:$0xff]  ;;  %v610_v9 = vld [vmem:[%s860_s0 + $0x28] sm:$0xff]  ;;  %v615_v14 = vld [vmem:[%s860_s0 + $0x50] sm:$0xff] }
   0x5   :  { %v614_v10 = vld [vmem:[%s860_s0 + $0x48] sm:$0xff]  ;;  %v619_v15 = vld [vmem:[%s860_s0 + $0x70] sm:$0xff]  ;;  %v612_v17 = vld [vmem:[%s860_s0 + $0x38] sm:$0xff] }
   0x6   :  { %220 = vmatpush.bf16.msra.mxu0 %v627_v1  ;;  %640 = vmatpush.bf16.msra.mxu1 %v627_v1  ;;  %v618_v11 = vld [vmem:[%s860_s0 + $0x68] sm:$0xff]  ;;  %v607_v16 = vld [vmem:[%s860_s0 + $0x10] sm:$0xff]  ;;  %v616_v18 = vld [vmem:[%s860_s0 + $0x58] sm:$0xff] }
   0x7   :  { %641 = vmatpush.bf16.msra.mxu2 %v627_v1  ;;  %642 = vmatpush.bf16.msra.mxu3 %v627_v1  ;;  %v606_v12 = vld [vmem:[%s860_s0 + $0x8] sm:$0xff]  ;;  %v620_v19 = vld [vmem:[%s860_s0 + $0x78] sm:$0xff]  ;;  %v613_v21 = vld [vmem:[%s860_s0 + $0x40] sm:$0xff] }
   0x8   :  { %v608_v20 = vld [vmem:[%s860_s0 + $0x18] sm:$0xff]  ;;  %v617_v22 = vld [vmem:[%s860_s0 + $0x60] sm:$0xff] }
   0x9   :  { %v609_v23 = vld [vmem:[%s860_s0 + $0x20] sm:$0xff] }
   0xa   :  { %221 = vmatpush.bf16.msra.mxu0 %v626_v2  ;;  %643 = vmatpush.bf16.msra.mxu1 %v626_v2  ;;  %v773_v24 = vld [vmem:[%s859_s2] ss:$0 sm:$0xff] }
   0xb   :  { %644 = vmatpush.bf16.msra.mxu2 %v626_v2  ;;  %645 = vmatpush.bf16.msra.mxu3 %v626_v2 }
   0xe   :  { %222 = vmatpush.bf16.msra.mxu0 %v625_v3  ;;  %646 = vmatpush.bf16.msra.mxu1 %v625_v3 }
   0xf   :  { %647 = vmatpush.bf16.msra.mxu2 %v625_v3  ;;  %648 = vmatpush.bf16.msra.mxu3 %v625_v3 }
  0x12   :  { %223 = vmatpush.bf16.msra.mxu0 %v624_v4  ;;  %649 = vmatpush.bf16.msra.mxu1 %v624_v4 }
  0x13   :  { %650 = vmatpush.bf16.msra.mxu2 %v624_v4  ;;  %651 = vmatpush.bf16.msra.mxu3 %v624_v4 }
  0x16   :  { %224 = vmatpush.bf16.msra.mxu0 %v623_v5  ;;  %652 = vmatpush.bf16.msra.mxu1 %v623_v5 }
  0x17   :  { %653 = vmatpush.bf16.msra.mxu2 %v623_v5  ;;  %654 = vmatpush.bf16.msra.mxu3 %v623_v5 }
  0x1a   :  { %225 = vmatpush.bf16.msra.mxu0 %v622_v6  ;;  %655 = vmatpush.bf16.msra.mxu1 %v622_v6 }
  0x1b   :  { %656 = vmatpush.bf16.msra.mxu2 %v622_v6  ;;  %657 = vmatpush.bf16.msra.mxu3 %v622_v6 }
  0x1e   :  { %226 = vmatpush.bf16.msra.mxu0 %v621_v7  ;;  %658 = vmatpush.bf16.msra.mxu1 %v621_v7 }
  0x1f   :  { %659 = vmatpush.bf16.msra.mxu2 %v621_v7  ;;  %660 = vmatpush.bf16.msra.mxu3 %v621_v7 }
  0x21   :  { %227 = vmatmul.bf16.vlgmr.msra.gmra.mxu0 %v605_v8  ;;  %252 = vmatmul.bf16.vlgmr.msra.gmra.mxu1 %v610_v9 }
  0x22   :  { %272 = vmatmul.bf16.vlgmr.msra.gmra.mxu2 %v614_v10  ;;  %292 = vmatmul.bf16.vlgmr.msra.gmra.mxu3 %v618_v11 }
  0x31   :  { %232 = vmatmul.bf16.gmra.mxu0 %v606_v12  ;;  %257 = vmatmul.bf16.gmra.mxu1 %v611_v13 }
  0x32   :  { %277 = vmatmul.bf16.gmra.mxu2 %v615_v14  ;;  %297 = vmatmul.bf16.gmra.mxu3 %v619_v15 }
  0x41   :  { %237 = vmatmul.bf16.gmra.mxu0 %v607_v16  ;;  %262 = vmatmul.bf16.gmra.mxu1 %v612_v17 }
  0x42   :  { %282 = vmatmul.bf16.gmra.mxu2 %v616_v18  ;;  %302 = vmatmul.bf16.gmra.mxu3 %v620_v19 }
  0x51   :  { %242 = vmatmul.bf16.gmra.mxu0 %v608_v20  ;;  %267 = vmatmul.bf16.gmra.mxu1 %v613_v21 }
  0x52   :  { %287 = vmatmul.bf16.gmra.mxu2 %v617_v22 }
  0x61   :  { %247 = vmatmul.bf16.gmra.mxu0 %v609_v23 }
  0x9e   :  { %v228_v25 = vpop.f32.mrf.mxu0  ;;  %v253_v26 = vpop.f32.mrf.mxu1 }
  0x9f   :  { %v229_v27 = vadd.f32 %v773_v24, %v228_v25  ;;  %v254_v4 = vadd.f32 %v773_v24, %v253_v26 }
  0xa1   :  { %v308_v34 = vmax.f32 %v229_v27, 0.0  ;;  %v318_v17 = vmax.f32 %v254_v4, 0.0 }
  0xa5   :  { %v273_v28 = vpop.f32.mrf.mxu2  ;;  %v293_v29 = vpop.f32.mrf.mxu3 }
  0xa6   :  { %v274_v30 = vadd.f32 %v773_v24, %v273_v28  ;;  %v230_v31 = vpop.f32.mrf.mxu0  ;;  %v255_v32 = vpop.f32.mrf.mxu1  ;;  %v294_v21 = vadd.f32 %v773_v24, %v293_v29 }
  0xa7   :  { %v231_v33 = vadd.f32 %v773_v24, %v230_v31  ;;  %v256_v6 = vadd.f32 %v773_v24, %v255_v32 }
  0xa8   :  { %v326_v43 = vmax.f32 %v274_v30, 0.0  ;;  %v334_v30 = vmax.f32 %v294_v21, 0.0  ;;  %v630_v21 = vld [vmem:[%s861_s4 + $0x8] sm:$0xff] }
  0xa9   :  { %v309_v35 = vmax.f32 %v231_v33, 0.0  ;;  %v319_v18 = vmax.f32 %v256_v6, 0.0  ;;  %v633_v6 = vld [vmem:[%s861_s4 + $0x20] sm:$0xff] }
  0xab   :  { %v778_v36 = vpack.c.bf16 %v309_v35, %v308_v34  ;;  %v346_v27 = vpack.c.bf16 %v319_v18, %v318_v17 }
  0xad   :  { %v275_v37 = vpop.f32.mrf.mxu2  ;;  %v295_v38 = vpop.f32.mrf.mxu3 }
  0xae   :  { %v276_v39 = vadd.f32 %v773_v24, %v275_v37  ;;  %v233_v40 = vpop.f32.mrf.mxu0  ;;  %v258_v41 = vpop.f32.mrf.mxu1  ;;  %v296_v22 = vadd.f32 %v773_v24, %v295_v38 }
  0xaf   :  { %v234_v42 = vadd.f32 %v773_v24, %v233_v40  ;;  %v259_v63 = vadd.f32 %v773_v24, %v258_v41 }
  0xb0   :  { %v327_v44 = vmax.f32 %v276_v39, 0.0  ;;  %v335_v31 = vmax.f32 %v296_v22, 0.0 }
  0xb1   :  { %v310_v51 = vmax.f32 %v234_v42, 0.0  ;;  %v320_v7 = vmax.f32 %v259_v63, 0.0 }
  0xb2   :  { %v782_v45 = vpack.c.bf16 %v327_v44, %v326_v43  ;;  %v354_v34 = vpack.c.bf16 %v335_v31, %v334_v30  ;;  %v636_v44 = vld [vmem:[%s861_s4 + $0x38] sm:$0xff] }
  0xb3   :  { %459 = vmatpush.bf16.msrb.mxu3 %v636_v44 }
  0xb5   :  { %v784_v46 = vpop.f32.mrf.mxu2  ;;  %v298_v47 = vpop.f32.mrf.mxu3 }
  0xb6   :  { %v235_v48 = vpop.f32.mrf.mxu0  ;;  %v260_v49 = vpop.f32.mrf.mxu1  ;;  %v299_v12 = vadd.f32 %v773_v24, %v298_v47 }
  0xb7   :  { %v236_v50 = vadd.f32 %v773_v24, %v235_v48  ;;  %v261_v0 = vadd.f32 %v773_v24, %v260_v49 }
  0xb8   :  { %v336_v23 = vmax.f32 %v299_v12, 0.0 }
  0xb9   :  { %v311_v52 = vmax.f32 %v236_v50, 0.0  ;;  %v321_v8 = vmax.f32 %v261_v0, 0.0  ;;  %v635_v50 = vld [vmem:[%s861_s4 + $0x30] sm:$0xff] }
  0xba   :  { %460 = vmatpush.bf16.msrb.mxu3 %v635_v50 }
  0xbb   :  { %v787_v53 = vpack.c.bf16 %v311_v52, %v310_v51  ;;  %v347_v19 = vpack.c.bf16 %v321_v8, %v320_v7  ;;  %v279_v51 = vadd.f32 %v773_v24, %v784_v46 }
  0xbd   :  { %v280_v54 = vpop.f32.mrf.mxu2  ;;  %v300_v55 = vpop.f32.mrf.mxu3  ;;  %v328_v0 = vmax.f32 %v279_v51, 0.0 }
  0xbe   :  { %v789_v56 = vpop.f32.mrf.mxu0  ;;  %v263_v57 = vpop.f32.mrf.mxu1  ;;  %v301_v13 = vadd.f32 %v773_v24, %v300_v55  ;;  %v281_v47 = vadd.f32 %v773_v24, %v280_v54  ;;  %v634_v54 = vld [vmem:[%s861_s4 + $0x28] sm:$0xff] }
  0xbf   :  { %v264_v58 = vadd.f32 %v773_v24, %v263_v57  ;;  %461 = vmatpush.bf16.msrb.mxu3 %v634_v54 }
  0xc0   :  { %v337_v25 = vmax.f32 %v301_v13, 0.0  ;;  %v329_v57 = vmax.f32 %v281_v47, 0.0 }
  0xc1   :  { %v322_v1 = vmax.f32 %v264_v58, 0.0 }
  0xc2   :  { %v355_v33 = vpack.c.bf16 %v337_v25, %v336_v23  ;;  %v629_v23 = vld [vmem:[%s861_s4] sm:$0xff] }
  0xc3   :  { %462 = vmatpush.bf16.msrb.mxu3 %v633_v6 }
  0xc5   :  { %v283_v59 = vpop.f32.mrf.mxu2  ;;  %v303_v60 = vpop.f32.mrf.mxu3 }
  0xc6   :  { %v792_v61 = vpop.f32.mrf.mxu0  ;;  %v265_v62 = vpop.f32.mrf.mxu1  ;;  %v304_v5 = vadd.f32 %v773_v24, %v303_v60  ;;  %v284_v41 = vadd.f32 %v773_v24, %v283_v59 }
  0xc7   :  { %v266_v2 = vadd.f32 %v773_v24, %v265_v62  ;;  %v241_v7 = vadd.f32 %v773_v24, %v792_v61 }
  0xc8   :  { %v338_v14 = vmax.f32 %v304_v5, 0.0  ;;  %v330_v52 = vmax.f32 %v284_v41, 0.0 }
  0xc9   :  { %v323_v3 = vmax.f32 %v266_v2, 0.0  ;;  %v313_v61 = vmax.f32 %v241_v7, 0.0 }
  0xcb   :  { %v348_v9 = vpack.c.bf16 %v323_v3, %v322_v1  ;;  %v351_v3 = vpack.c.bf16 %v329_v57, %v328_v0 }
  0xcd   :  { %v285_v10 = vpop.f32.mrf.mxu2  ;;  %v305_v11 = vpop.f32.mrf.mxu3  ;;  %364 = vmatpush.bf16.msrb.mxu1 %v348_v9 }
  0xce   :  { %v306_v15 = vadd.f32 %v773_v24, %v305_v11  ;;  %v243_v16 = vpop.f32.mrf.mxu0  ;;  %v268_v37 = vpop.f32.mrf.mxu1  ;;  %v286_v38 = vadd.f32 %v773_v24, %v285_v10  ;;  %v340_v10 = vld [vmem:[%s862_s3] sm:$0xff]  ;;  %v239_v11 = vadd.f32 %v773_v24, %v789_v56 }
  0xcf   :  { %v244_v46 = vadd.f32 %v773_v24, %v243_v16  ;;  %v269_v4 = vadd.f32 %v773_v24, %v268_v37  ;;  %v359_v17 = vunpack.c.h.b16 %v340_v10  ;;  %v358_v22 = vunpack.c.l.b16 %v340_v10 }
  0xd0   :  { %v339_v20 = vmax.f32 %v306_v15, 0.0  ;;  %v331_v48 = vmax.f32 %v286_v38, 0.0  ;;  %v632_v15 = vld [vmem:[%s861_s4 + $0x18] sm:$0xff]  ;;  %v312_v18 = vmax.f32 %v239_v11, 0.0 }
  0xd1   :  { %365 = vmatpush.bf16.msrb.mxu1 %v347_v19  ;;  %v314_v12 = vmax.f32 %v244_v46, 0.0  ;;  %v324_v13 = vmax.f32 %v269_v4, 0.0  ;;  %463 = vmatpush.bf16.msrb.mxu3 %v632_v15 }
  0xd2   :  { %v356_v26 = vpack.c.bf16 %v339_v20, %v338_v14  ;;  %v352_v59 = vpack.c.bf16 %v331_v48, %v330_v52  ;;  %v343_v56 = vpack.c.bf16 %v313_v61, %v312_v18  ;;  %v361_v20 = vpack.c.b16 %v359_v17, %v359_v17 }
  0xd4   :  { %377 = vmatpush.bf16.msrb.mxu2 %v356_v26 }
  0xd5   :  { %v288_v28 = vpop.f32.mrf.mxu2  ;;  %366 = vmatpush.bf16.msrb.mxu1 %v346_v27 }
  0xd6   :  { %v245_v32 = vpop.f32.mrf.mxu0  ;;  %v289_v35 = vadd.f32 %v773_v24, %v288_v28  ;;  %v270_v63 = vpop.f32.mrf.mxu1 }
  0xd7   :  { %v246_v60 = vadd.f32 %v773_v24, %v245_v32  ;;  %v271_v5 = vadd.f32 %v773_v24, %v270_v63 }
  0xd8   :  { %378 = vmatpush.bf16.msrb.mxu2 %v355_v33  ;;  %v332_v42 = vmax.f32 %v289_v35, 0.0 }
  0xd9   :  { %v315_v8 = vmax.f32 %v246_v60, 0.0  ;;  %v325_v14 = vmax.f32 %v271_v5, 0.0 }
  0xdb   :  { %v344_v16 = vpack.c.bf16 %v315_v8, %v314_v12  ;;  %v349_v19 = vpack.c.bf16 %v325_v14, %v324_v13 }
  0xdc   :  { %379 = vmatpush.bf16.msrb.mxu2 %v354_v34 }
  0xdd   :  { %v290_v29 = vpop.f32.mrf.mxu2 }
  0xde   :  { %v291_v39 = vadd.f32 %v773_v24, %v290_v29  ;;  %v248_v40 = vpop.f32.mrf.mxu0 }
  0xdf   :  { %v249_v55 = vadd.f32 %v773_v24, %v248_v40 }
  0xe0   :  { %v333_v43 = vmax.f32 %v291_v39, 0.0 }
  0xe1   :  { %v316_v1 = vmax.f32 %v249_v55, 0.0 }
  0xe2   :  { %v353_v49 = vpack.c.bf16 %v333_v43, %v332_v42 }
  0xe4   :  { %380 = vmatpush.bf16.msrb.mxu2 %v353_v49 }
  0xe6   :  { %v250_v58 = vpop.f32.mrf.mxu0 }
  0xe7   :  { %v251_v62 = vadd.f32 %v773_v24, %v250_v58  ;;  %v631_v24 = vld [vmem:[%s861_s4 + $0x10] sm:$0xff] }
  0xe8   :  { %381 = vmatpush.bf16.msrb.mxu2 %v352_v59  ;;  %464 = vmatpush.bf16.msrb.mxu3 %v631_v24 }
  0xe9   :  { %v317_v2 = vmax.f32 %v251_v62, 0.0 }
  0xeb   :  { %v345_v9 = vpack.c.bf16 %v317_v2, %v316_v1 }
  0xec   :  { %382 = vmatpush.bf16.msrb.mxu2 %v351_v3  ;;  %465 = vmatpush.bf16.msrb.mxu3 %v630_v21 }
  0xed   :  { %367 = vmatpush.bf16.msrb.mxu1 %v345_v9 }
  0xf0   :  { %383 = vmatpush.bf16.msrb.mxu2 %v782_v45  ;;  %v360_v45 = vpack.c.b16 %v358_v22, %v358_v22  ;;  %466 = vmatpush.bf16.msrb.mxu3 %v629_v23 }
  0xf1   :  { %368 = vmatpush.bf16.msrb.mxu1 %v344_v16 }
  0xf4   :  { %384 = vmatpush.bf16.msrb.mxu2 %v349_v19 }
  0xf5   :  { %369 = vmatpush.bf16.msrb.mxu1 %v343_v56 }
  0xf7   :  { %385 = vmatmul.bf16.vlgmr.msrb.gmra.mxu2 %v361_v20 }
  0xf9   :  { %370 = vmatpush.bf16.msrb.mxu1 %v787_v53  ;;  %v662_v53 = vld [vmem:[%s863_s5] ss:$0 sm:$0xff] }
  0xfd   :  { %371 = vmatpush.bf16.msrb.mxu1 %v778_v36 }
 0x100   :  { %372 = vmatmul.bf16.vlgmr.msrb.gmra.mxu1 %v360_v45 }
 0x17a   :  { %v386_v25 = vpop.f32.mrf.mxu2 }
 0x17d   :  { %v373_v26 = vpop.f32.mrf.mxu1 }
 0x17e   :  { %v387_v27 = vadd.f32 %v386_v25, %v373_v26 }
 0x180   :  { %v390_v28 = vpack.c.bf16 %v387_v27, %v387_v27 }
 0x182   :  { %467 = vmatmul.bf16.vlgmr.msrb.gmra.mxu3 %v390_v28  ;;  %v388_v30 = vpop.f32.mrf.mxu2 }
 0x185   :  { %v375_v31 = vpop.f32.mrf.mxu1 }
 0x205   :  { %v468_v32 = vpop.f32.mrf.mxu3 }
 0x206   :  { %v469_v33 = vadd.f32 %v662_v53, %v468_v32 }
 0x208   :  { %472 = vst [vmem:[%s864_s6] sm:$0xff] %v469_v33 }
 0x20d   :  { %v470_v36 = vpop.f32.mrf.mxu3 }

</bundles_post_ra>
